<compile_context>
chip_gen: v5e
topology: v5e:2x2
jax: 0.10.0
libtpu: 0.0.40
codegen_flags: <defaults>
</compile_context>

<pallas_src>
import functools

import jax
import jax.numpy as jnp
from jax import lax
from jax.experimental import pallas as pl
from jax.experimental.pallas import tpu as pltpu


# ----------------------------------------------------------------------------
# Fused kernel: localizer MLP + affine_grid + grid_sample
# (bilinear, padding_mode='zeros', align_corners=False — PyTorch defaults)
# ----------------------------------------------------------------------------
def _stn_fused_kernel(feat_ref, w1_ref, b1_ref, w2_ref, b2_ref, tpl_ref,
                      o8_ref, out_ref, *, H, W, C, G, tile_out):
    HW = H * W
    num_strips = HW // tile_out
    fW = jnp.float32(W)
    fH = jnp.float32(H)
    in_feat = feat_ref.shape[-1]

    # ---- Localizer MLP for this batch group (tiny; fused to avoid a second
    # pallas_call launch and an HBM round-trip of theta). ---------------------
    f = feat_ref[...].reshape(G, in_feat)                              # (G, F)
    h = jnp.dot(f, w1_ref[...], preferred_element_type=jnp.float32) + b1_ref[...]
    h = jnp.maximum(h, 0.0)                                            # ReLU
    o = jnp.dot(h, w2_ref[...],
                preferred_element_type=jnp.float32) + b2_ref[...]      # (G, 8)
    o8_ref[...] = o[:, None, :]

    # Input row / column index columns (shared by all elements & strips).
    row_ids = lax.broadcasted_iota(jnp.int32, (H, 1), 0)
    col_ids = lax.broadcasted_iota(jnp.int32, (W, 1), 0)

    pow2 = (W & (W - 1)) == 0
    lw = W.bit_length() - 1

    for i in range(G):                                   # static, G is small
        # theta components for element i as (1,1) scalars (hoisted per element).
        t00, t01, t02 = o[i:i + 1, 0:1], o[i:i + 1, 1:2], o[i:i + 1, 2:3]
        t10, t11, t12 = o[i:i + 1, 3:4], o[i:i + 1, 4:5], o[i:i + 1, 5:6]
        tpl_i = tpl_ref[i].astype(jnp.float32)           # (C*H, W), hoisted

        def strip_body(s, t00=t00, t01=t01, t02=t02,
                       t10=t10, t11=t11, t12=t12, tpl_i=tpl_i, i=i):
            if isinstance(s, int):
                start = s * tile_out                     # static (single strip)
            else:
                start = pl.multiple_of(s * tile_out, tile_out)

            out_idx = lax.broadcasted_iota(jnp.int32, (1, tile_out), 1) + start
            if pow2:
                oi = (out_idx >> lw).astype(jnp.float32)         # output row
                oj = (out_idx & (W - 1)).astype(jnp.float32)     # output col
            else:
                oi = (out_idx // W).astype(jnp.float32)
                oj = (out_idx % W).astype(jnp.float32)

            # F.affine_grid base grid (align_corners=False) + affine transform.
            xn = (2.0 * oj + 1.0) / fW - 1.0                     # (1, T)
            yn = (2.0 * oi + 1.0) / fH - 1.0
            gx = t00 * xn + t01 * yn + t02                       # (1, T)
            gy = t10 * xn + t11 * yn + t12

            # F.grid_sample un-normalization (align_corners=False).
            ix = ((gx + 1.0) * fW - 1.0) * 0.5
            iy = ((gy + 1.0) * fH - 1.0) * 0.5
            ix0f = jnp.floor(ix)
            iy0f = jnp.floor(iy)
            wx1 = ix - ix0f
            wx0 = 1.0 - wx1
            wy1 = iy - iy0f
            wy0 = 1.0 - wy1
            ix0 = ix0f.astype(jnp.int32)
            iy0 = iy0f.astype(jnp.int32)
            ix1 = ix0 + 1
            iy1 = iy0 + 1

            # Separable bilinear one-hot factors.  Out-of-range corners never
            # match an in-range index -> padding_mode='zeros'.  iy0 != iy1 and
            # ix0 != ix1, so the nested selects equal summed one-hots.
            rowfac = jnp.where(row_ids == iy0, wy0,
                               jnp.where(row_ids == iy1, wy1, 0.0))   # (H, T)
            colfac = jnp.where(col_ids == ix0, wx0,
                               jnp.where(col_ids == ix1, wx1, 0.0))   # (W, T)

            # Column interpolation on the MXU: (C*H, W) @ (W, T) -> (C*H, T).
            A = jnp.dot(tpl_i, colfac, preferred_element_type=jnp.float32)
            # Row interpolation: elementwise weight + H-way sublane reduce.
            res = jnp.sum(A.reshape(C, H, tile_out) * rowfac[None, :, :],
                          axis=1)                                     # (C, T)
            out_ref[i, :, pl.ds(start, tile_out)] = res.astype(out_ref.dtype)

        if num_strips == 1:
            strip_body(0)
        else:
            @pl.loop(0, num_strips)
            def _(s):
                strip_body(s)


def _pick_group_size(B):
    """Per-generation batch grouping (grid = (B // G,))."""
    try:
        kind = jax.devices()[0].device_kind.lower()
    except Exception:  # pragma: no cover
        kind = ""
    if ("v7" in kind or "7x" in kind) and B >= 2:
        # Two TensorCores per chip: keep >= 2 grid steps so the "parallel"
        # batch axis can be sharded across them.
        g = max(1, B // 2)
    else:
        # Single-TC chips (v5e/v6e): fewer, larger steps amortize the ~0.35us
        # per-step pipeline overhead.
        g = min(B, 8)
    while B % g != 0:
        g -= 1
    return max(g, 1)


def _pick_tile_out(HW, W, cap=4096):
    """Output-column strip size; bounds per-strip VMEM at large H, W."""
    if HW <= cap:
        return HW
    best, t = W, W
    while t <= cap:
        if HW % t == 0:
            best = t
        t += W
    return best


def affine_stn_pallas(feat, w1, b1, w2, b2, template, *, group_size=None):
    """Returns (o8, y): raw localizer head output (B, 8) and sampled (B,C,H,W)."""
    B, C, H, W = template.shape
    HW = H * W
    in_feat = feat.shape[1]
    fc_dim = w1.shape[1]

    G = _pick_group_size(B) if group_size is None else group_size
    assert B % G == 0

    # Layouts chosen so every BlockSpec's last two dims equal the full array
    # dims (safe for any G):
    #   feat     (B, 1, in_feat)   -> block (G, 1, in_feat)
    #   template (B, C*H, W)       -> block (G, C*H, W)   (MXU-LHS layout)
    #   output   (B, C, HW)        -> block (G, C, HW)    (lane-dense stores)
    feat3 = feat.reshape(B, 1, in_feat)
    tpl_chw = template.reshape(B, C * H, W)

    tile_out = _pick_tile_out(HW, W)
    assert HW % tile_out == 0

    itemsize = jnp.dtype(template.dtype).itemsize
    flops = int(2 * B * (in_feat * fc_dim + fc_dim * 8)    # localizer matmuls
                + 2 * B * C * H * W * HW                   # colfac matmul
                + 3 * B * C * H * HW)                      # row weight + reduce
    bytes_accessed = int(B * in_feat * 4
                         + (in_feat * fc_dim + fc_dim + fc_dim * 8 + 8) * 4
                         + 2 * B * C * HW * itemsize       # template + output
                         + B * 8 * 4)

    kernel = functools.partial(_stn_fused_kernel, H=H, W=W, C=C, G=G,
                               tile_out=tile_out)
    o8, y_flat = pl.pallas_call(
        kernel,
        out_shape=(jax.ShapeDtypeStruct((B, 1, 8), jnp.float32),
                   jax.ShapeDtypeStruct((B, C, HW), template.dtype)),
        grid=(B // G,),
        in_specs=[
            pl.BlockSpec((G, 1, in_feat), lambda g: (g, 0, 0)),    # feat group
            pl.BlockSpec((in_feat, fc_dim), lambda g: (0, 0)),     # w1
            pl.BlockSpec((1, fc_dim), lambda g: (0, 0)),           # b1
            pl.BlockSpec((fc_dim, 8), lambda g: (0, 0)),           # w2
            pl.BlockSpec((1, 8), lambda g: (0, 0)),                # b2
            pl.BlockSpec((G, C * H, W), lambda g: (g, 0, 0)),      # template
        ],
        out_specs=(pl.BlockSpec((G, 1, 8), lambda g: (g, 0, 0)),
                   pl.BlockSpec((G, C, HW), lambda g: (g, 0, 0))),
        compiler_params=pltpu.CompilerParams(
            # Batch-group axis is fully independent -> shard across v7x's two
            # TensorCores; harmless on v5e/v6e.
            dimension_semantics=("parallel",)),
        cost_estimate=pl.CostEstimate(flops=flops, transcendentals=0,
                                      bytes_accessed=bytes_accessed),
    )(feat3, w1, b1, w2, b2, tpl_chw)
    return o8.reshape(B, 8), y_flat.reshape(B, C, H, W)


# ----------------------------------------------------------------------------
# Full AffineSTNNet forward
# ----------------------------------------------------------------------------
def init_params(key, in_feat, fc_dim):
    k1, k2 = jax.random.split(key)
    w1 = jax.random.normal(k1, (in_feat, fc_dim), jnp.float32) * 0.05
    b1 = jnp.zeros((1, fc_dim), jnp.float32)
    # Head padded to 8 lanes (6 theta + 1 scale + 1 unused) for dense stores.
    w2 = jax.random.normal(k2, (fc_dim, 8), jnp.float32) * 0.01
    # Standard STN init: bias the theta head to the identity transform.
    b2 = jnp.array([[1.0, 0.0, 0.0, 0.0, 1.0, 0.0, 0.0, 0.0]], jnp.float32)
    return dict(w1=w1, b1=b1, w2=w2, b2=b2)


def affine_stn_forward(x, template, params, downsample_dim=4):
    B, C, H, W = x.shape
    ds = downsample_dim
    # TODO(synk): AffineLocalizer's backbone source is not provided; a
    # canonical STN localizer (adaptive avg-pool -> FC -> ReLU -> FC) is used.
    feat = x.reshape(B, C, ds, H // ds, ds, W // ds).mean(axis=(3, 5))
    feat = feat.reshape(B, C * ds * ds)

    o8, y = affine_stn_pallas(feat, params["w1"], params["b1"],
                              params["w2"], params["b2"], template)
    theta = o8[:, :6].reshape(B, 2, 3)
    # TODO(synk): exact scale-head activation is unknown; sigmoid assumed.
    output_scale = jax.nn.sigmoid(o8[:, 6:7])
    return y, theta, output_scale


# ----------------------------------------------------------------------------
# Pure-JAX reference for F.affine_grid + F.grid_sample (bilinear, zeros,
# align_corners=False), used only for the correctness check in __main__.
# ----------------------------------------------------------------------------
def _affine_grid_sample_ref(template, theta):
    B, C, H, W = template.shape
    xs = (2.0 * jnp.arange(W, dtype=jnp.float32) + 1.0) / W - 1.0
    ys = (2.0 * jnp.arange(H, dtype=jnp.float32) + 1.0) / H - 1.0
    xn = jnp.broadcast_to(xs[None, :], (H, W))
    yn = jnp.broadcast_to(ys[:, None], (H, W))
    t = theta.astype(jnp.float32)
    gx = t[:, 0, 0, None, None] * xn + t[:, 0, 1, None, None] * yn + t[:, 0, 2, None, None]
    gy = t[:, 1, 0, None, None] * xn + t[:, 1, 1, None, None] * yn + t[:, 1, 2, None, None]
    ix = ((gx + 1.0) * W - 1.0) * 0.5
    iy = ((gy + 1.0) * H - 1.0) * 0.5
    ix0 = jnp.floor(ix)
    iy0 = jnp.floor(iy)
    wx1 = ix - ix0
    wx0 = 1.0 - wx1
    wy1 = iy - iy0
    wy0 = 1.0 - wy1

    def corner(iyc, ixc, w):
        iyi = iyc.astype(jnp.int32)
        ixi = ixc.astype(jnp.int32)
        valid = ((iyi >= 0) & (iyi < H) & (ixi >= 0) & (ixi < W)).astype(jnp.float32)
        iyi = jnp.clip(iyi, 0, H - 1)
        ixi = jnp.clip(ixi, 0, W - 1)
        b_idx = jnp.arange(B)[:, None, None, None]
        c_idx = jnp.arange(C)[None, :, None, None]
        v = template[b_idx, c_idx, iyi[:, None], ixi[:, None]].astype(jnp.float32)
        return v * (w * valid)[:, None]

    return (corner(iy0, ix0, wy0 * wx0) + corner(iy0, ix0 + 1.0, wy0 * wx1)
            + corner(iy0 + 1.0, ix0, wy1 * wx0) + corner(iy0 + 1.0, ix0 + 1.0, wy1 * wx1))


if __name__ == "__main__":
    key = jax.random.PRNGKey(0)
    kx, kt, kp = jax.random.split(key, 3)

    B, C, H, W = 2, 4, 16, 16
    downsample_dim = 4
    fc_dim = 32

    x = jax.random.normal(kx, (B, C, H, W), jnp.float32)
    template = jax.random.normal(kt, (B, C, H, W), jnp.float32)
    params = init_params(kp, C * downsample_dim * downsample_dim, fc_dim)

    y, theta, output_scale = affine_stn_forward(
        x, template, params, downsample_dim=downsample_dim)
    jax.block_until_ready((y, theta, output_scale))

    assert y.shape == (B, C, H, W)
    assert theta.shape == (B, 2, 3)
    assert output_scale.shape == (B, 1)

    # Correctness vs. pure-JAX affine_grid + grid_sample reference.
    y_ref = _affine_grid_sample_ref(template, theta)
    assert bool(jnp.allclose(y.astype(jnp.float32), y_ref, atol=1e-4, rtol=1e-4))

    print("KERNEL_OK")
</pallas_src>

<mosaic_0001>
module attributes {stable_mosaic.version = 11 : i64} {
  func.func @_stn_fused_kernel(%arg0: i32, %arg1: memref<2x1x64xf32, #tpu.memory_space<vmem>>, %arg2: memref<64x32xf32, #tpu.memory_space<vmem>>, %arg3: memref<1x32xf32, #tpu.memory_space<vmem>>, %arg4: memref<32x8xf32, #tpu.memory_space<vmem>>, %arg5: memref<1x8xf32, #tpu.memory_space<vmem>>, %arg6: memref<2x64x16xf32, #tpu.memory_space<vmem>>, %arg7: memref<2x1x8xf32, #tpu.memory_space<vmem>>, %arg8: memref<2x4x256xf32, #tpu.memory_space<vmem>>) attributes {dimension_semantics = [#tpu.dimension_semantics<parallel>], iteration_bounds = array<i64: 1>, scalar_prefetch = 0 : i64, scratch_operands = 0 : i64, tpu.core_type = #tpu.core_type<tc>, window_params = [{transform_indices = @transform_0, window_bounds = array<i64: 2, 1, 64>}, {pipeline_mode = #tpu.pipeline_mode<synchronous>, transform_indices = @transform_1, window_bounds = array<i64: 64, 32>}, {pipeline_mode = #tpu.pipeline_mode<synchronous>, transform_indices = @transform_2, window_bounds = array<i64: 1, 32>}, {pipeline_mode = #tpu.pipeline_mode<synchronous>, transform_indices = @transform_3, window_bounds = array<i64: 32, 8>}, {pipeline_mode = #tpu.pipeline_mode<synchronous>, transform_indices = @transform_4, window_bounds = array<i64: 1, 8>}, {transform_indices = @transform_5, window_bounds = array<i64: 2, 64, 16>}, {transform_indices = @transform_6, window_bounds = array<i64: 2, 1, 8>}, {transform_indices = @transform_7, window_bounds = array<i64: 2, 4, 256>}]} {
    %c0 = arith.constant 0 : index
    %c0_0 = arith.constant 0 : index
    %c0_1 = arith.constant 0 : index
    %0 = vector.load %arg1[%c0, %c0_0, %c0_1] : memref<2x1x64xf32, #tpu.memory_space<vmem>>, vector<2x1x64xf32>
    %1 = vector.shape_cast %0 : vector<2x1x64xf32> to vector<2x64xf32>
    %c0_2 = arith.constant 0 : index
    %c0_3 = arith.constant 0 : index
    %2 = vector.load %arg2[%c0_2, %c0_3] : memref<64x32xf32, #tpu.memory_space<vmem>>, vector<64x32xf32>
    %cst = arith.constant dense<0.000000e+00> : vector<2x32xf32>
    %3 = tpu.matmul %1, %2, %cst {dimension_numbers = #tpu.dot_dimension_numbers<[1], [0], [0], [1], [0, 0, 1, 1], [], []>} : vector<2x64xf32>, vector<64x32xf32>, vector<2x32xf32> -> vector<2x32xf32>
    %c0_4 = arith.constant 0 : index
    %c0_5 = arith.constant 0 : index
    %4 = vector.load %arg3[%c0_4, %c0_5] : memref<1x32xf32, #tpu.memory_space<vmem>>, vector<1x32xf32>
    %5 = vector.broadcast %4 : vector<1x32xf32> to vector<2x32xf32>
    %6 = arith.addf %3, %5 : vector<2x32xf32>
    %cst_6 = arith.constant 0.000000e+00 : f32
    %7 = vector.broadcast %cst_6 : f32 to vector<2x32xf32>
    %8 = arith.maximumf %6, %7 : vector<2x32xf32>
    %c0_7 = arith.constant 0 : index
    %c0_8 = arith.constant 0 : index
    %9 = vector.load %arg4[%c0_7, %c0_8] : memref<32x8xf32, #tpu.memory_space<vmem>>, vector<32x8xf32>
    %cst_9 = arith.constant dense<0.000000e+00> : vector<2x8xf32>
    %10 = tpu.matmul %8, %9, %cst_9 {dimension_numbers = #tpu.dot_dimension_numbers<[1], [0], [0], [1], [0, 0, 1, 1], [], []>} : vector<2x32xf32>, vector<32x8xf32>, vector<2x8xf32> -> vector<2x8xf32>
    %c0_10 = arith.constant 0 : index
    %c0_11 = arith.constant 0 : index
    %11 = vector.load %arg5[%c0_10, %c0_11] : memref<1x8xf32, #tpu.memory_space<vmem>>, vector<1x8xf32>
    %12 = vector.broadcast %11 : vector<1x8xf32> to vector<2x8xf32>
    %13 = arith.addf %10, %12 : vector<2x8xf32>
    %14 = vector.shape_cast %13 : vector<2x8xf32> to vector<2x1x8xf32>
    %c0_12 = arith.constant 0 : index
    %c0_13 = arith.constant 0 : index
    %c0_14 = arith.constant 0 : index
    %15 = vector.load %arg7[%c0_12, %c0_13, %c0_14] : memref<2x1x8xf32, #tpu.memory_space<vmem>>, vector<2x1x8xf32>
    tpu.vector_store %arg7[%c0_12, %c0_13, %c0_14], %14 {strides = array<i32>} : memref<2x1x8xf32, #tpu.memory_space<vmem>>, vector<2x1x8xf32>,
    %16 = tpu.iota {dimensions = array<i32: 0>} : vector<16x1xi32>
    %17 = tpu.iota {dimensions = array<i32: 0>} : vector<16x1xi32>
    %18 = vector.extract_strided_slice %13 {offsets = [0, 0], sizes = [1, 1], strides = [1, 1]} : vector<2x8xf32> to vector<1x1xf32>
    %19 = vector.extract_strided_slice %13 {offsets = [0, 1], sizes = [1, 1], strides = [1, 1]} : vector<2x8xf32> to vector<1x1xf32>
    %20 = vector.extract_strided_slice %13 {offsets = [0, 2], sizes = [1, 1], strides = [1, 1]} : vector<2x8xf32> to vector<1x1xf32>
    %21 = vector.extract_strided_slice %13 {offsets = [0, 3], sizes = [1, 1], strides = [1, 1]} : vector<2x8xf32> to vector<1x1xf32>
    %22 = vector.extract_strided_slice %13 {offsets = [0, 4], sizes = [1, 1], strides = [1, 1]} : vector<2x8xf32> to vector<1x1xf32>
    %23 = vector.extract_strided_slice %13 {offsets = [0, 5], sizes = [1, 1], strides = [1, 1]} : vector<2x8xf32> to vector<1x1xf32>
    %c0_15 = arith.constant 0 : index
    %c0_16 = arith.constant 0 : index
    %c0_17 = arith.constant 0 : index
    %24 = vector.load %arg6[%c0_15, %c0_16, %c0_17] : memref<2x64x16xf32, #tpu.memory_space<vmem>>, vector<1x64x16xf32>
    %25 = vector.shape_cast %24 : vector<1x64x16xf32> to vector<64x16xf32>
    %26 = tpu.iota {dimensions = array<i32: 1>} : vector<1x256xi32>
    %c0_i32 = arith.constant 0 : i32
    %27 = vector.broadcast %c0_i32 : i32 to vector<1x256xi32>
    %28 = arith.addi %26, %27 : vector<1x256xi32>
    %c4_i32 = arith.constant 4 : i32
    %29 = vector.broadcast %c4_i32 : i32 to vector<1x256xi32>
    %30 = arith.shrsi %28, %29 : vector<1x256xi32>
    %31 = arith.sitofp %30 : vector<1x256xi32> to vector<1x256xf32>
    %c15_i32 = arith.constant 15 : i32
    %32 = vector.broadcast %c15_i32 : i32 to vector<1x256xi32>
    %33 = arith.andi %28, %32 : vector<1x256xi32>
    %34 = arith.sitofp %33 : vector<1x256xi32> to vector<1x256xf32>
    %cst_18 = arith.constant 2.000000e+00 : f32
    %35 = vector.broadcast %cst_18 : f32 to vector<1x256xf32>
    %36 = arith.mulf %35, %34 : vector<1x256xf32>
    %cst_19 = arith.constant 1.000000e+00 : f32
    %37 = vector.broadcast %cst_19 : f32 to vector<1x256xf32>
    %38 = arith.addf %36, %37 : vector<1x256xf32>
    %cst_20 = arith.constant 1.600000e+01 : f32
    %39 = vector.broadcast %cst_20 : f32 to vector<1x256xf32>
    %40 = arith.divf %38, %39 : vector<1x256xf32>
    %cst_21 = arith.constant 1.000000e+00 : f32
    %41 = vector.broadcast %cst_21 : f32 to vector<1x256xf32>
    %42 = arith.subf %40, %41 : vector<1x256xf32>
    %cst_22 = arith.constant 2.000000e+00 : f32
    %43 = vector.broadcast %cst_22 : f32 to vector<1x256xf32>
    %44 = arith.mulf %43, %31 : vector<1x256xf32>
    %cst_23 = arith.constant 1.000000e+00 : f32
    %45 = vector.broadcast %cst_23 : f32 to vector<1x256xf32>
    %46 = arith.addf %44, %45 : vector<1x256xf32>
    %cst_24 = arith.constant 1.600000e+01 : f32
    %47 = vector.broadcast %cst_24 : f32 to vector<1x256xf32>
    %48 = arith.divf %46, %47 : vector<1x256xf32>
    %cst_25 = arith.constant 1.000000e+00 : f32
    %49 = vector.broadcast %cst_25 : f32 to vector<1x256xf32>
    %50 = arith.subf %48, %49 : vector<1x256xf32>
    %51 = vector.broadcast %18 : vector<1x1xf32> to vector<1x256xf32>
    %52 = arith.mulf %51, %42 : vector<1x256xf32>
    %53 = vector.broadcast %19 : vector<1x1xf32> to vector<1x256xf32>
    %54 = arith.mulf %53, %50 : vector<1x256xf32>
    %55 = arith.addf %52, %54 : vector<1x256xf32>
    %56 = vector.broadcast %20 : vector<1x1xf32> to vector<1x256xf32>
    %57 = arith.addf %55, %56 : vector<1x256xf32>
    %58 = vector.broadcast %21 : vector<1x1xf32> to vector<1x256xf32>
    %59 = arith.mulf %58, %42 : vector<1x256xf32>
    %60 = vector.broadcast %22 : vector<1x1xf32> to vector<1x256xf32>
    %61 = arith.mulf %60, %50 : vector<1x256xf32>
    %62 = arith.addf %59, %61 : vector<1x256xf32>
    %63 = vector.broadcast %23 : vector<1x1xf32> to vector<1x256xf32>
    %64 = arith.addf %62, %63 : vector<1x256xf32>
    %cst_26 = arith.constant 1.000000e+00 : f32
    %65 = vector.broadcast %cst_26 : f32 to vector<1x256xf32>
    %66 = arith.addf %57, %65 : vector<1x256xf32>
    %cst_27 = arith.constant 1.600000e+01 : f32
    %67 = vector.broadcast %cst_27 : f32 to vector<1x256xf32>
    %68 = arith.mulf %66, %67 : vector<1x256xf32>
    %cst_28 = arith.constant 1.000000e+00 : f32
    %69 = vector.broadcast %cst_28 : f32 to vector<1x256xf32>
    %70 = arith.subf %68, %69 : vector<1x256xf32>
    %cst_29 = arith.constant 5.000000e-01 : f32
    %71 = vector.broadcast %cst_29 : f32 to vector<1x256xf32>
    %72 = arith.mulf %70, %71 : vector<1x256xf32>
    %cst_30 = arith.constant 1.000000e+00 : f32
    %73 = vector.broadcast %cst_30 : f32 to vector<1x256xf32>
    %74 = arith.addf %64, %73 : vector<1x256xf32>
    %cst_31 = arith.constant 1.600000e+01 : f32
    %75 = vector.broadcast %cst_31 : f32 to vector<1x256xf32>
    %76 = arith.mulf %74, %75 : vector<1x256xf32>
    %cst_32 = arith.constant 1.000000e+00 : f32
    %77 = vector.broadcast %cst_32 : f32 to vector<1x256xf32>
    %78 = arith.subf %76, %77 : vector<1x256xf32>
    %cst_33 = arith.constant 5.000000e-01 : f32
    %79 = vector.broadcast %cst_33 : f32 to vector<1x256xf32>
    %80 = arith.mulf %78, %79 : vector<1x256xf32>
    %81 = math.floor %72 : vector<1x256xf32>
    %82 = math.floor %80 : vector<1x256xf32>
    %83 = arith.subf %72, %81 : vector<1x256xf32>
    %cst_34 = arith.constant 1.000000e+00 : f32
    %84 = vector.broadcast %cst_34 : f32 to vector<1x256xf32>
    %85 = arith.subf %84, %83 : vector<1x256xf32>
    %86 = arith.subf %80, %82 : vector<1x256xf32>
    %cst_35 = arith.constant 1.000000e+00 : f32
    %87 = vector.broadcast %cst_35 : f32 to vector<1x256xf32>
    %88 = arith.subf %87, %86 : vector<1x256xf32>
    %89 = arith.fptosi %81 : vector<1x256xf32> to vector<1x256xi32>
    %90 = arith.fptosi %82 : vector<1x256xf32> to vector<1x256xi32>
    %c1_i32 = arith.constant 1 : i32
    %91 = vector.broadcast %c1_i32 : i32 to vector<1x256xi32>
    %92 = arith.addi %89, %91 : vector<1x256xi32>
    %c1_i32_36 = arith.constant 1 : i32
    %93 = vector.broadcast %c1_i32_36 : i32 to vector<1x256xi32>
    %94 = arith.addi %90, %93 : vector<1x256xi32>
    %95 = vector.broadcast %16 : vector<16x1xi32> to vector<16x256xi32>
    %96 = vector.broadcast %90 : vector<1x256xi32> to vector<16x256xi32>
    %97 = arith.cmpi eq, %95, %96 : vector<16x256xi32>
    %98 = vector.broadcast %16 : vector<16x1xi32> to vector<16x256xi32>
    %99 = vector.broadcast %94 : vector<1x256xi32> to vector<16x256xi32>
    %100 = arith.cmpi eq, %98, %99 : vector<16x256xi32>
    %cst_37 = arith.constant 0.000000e+00 : f32
    %101 = vector.shape_cast %86 : vector<1x256xf32> to vector<1x256xf32>
    %102 = vector.broadcast %101 : vector<1x256xf32> to vector<16x256xf32>
    %103 = vector.broadcast %cst_37 : f32 to vector<16x256xf32>
    %104 = arith.select %100, %102, %103 : vector<16x256xi1>, vector<16x256xf32>
    %105 = vector.shape_cast %88 : vector<1x256xf32> to vector<1x256xf32>
    %106 = vector.broadcast %105 : vector<1x256xf32> to vector<16x256xf32>
    %107 = arith.select %97, %106, %104 : vector<16x256xi1>, vector<16x256xf32>
    %108 = vector.broadcast %17 : vector<16x1xi32> to vector<16x256xi32>
    %109 = vector.broadcast %89 : vector<1x256xi32> to vector<16x256xi32>
    %110 = arith.cmpi eq, %108, %109 : vector<16x256xi32>
    %111 = vector.broadcast %17 : vector<16x1xi32> to vector<16x256xi32>
    %112 = vector.broadcast %92 : vector<1x256xi32> to vector<16x256xi32>
    %113 = arith.cmpi eq, %111, %112 : vector<16x256xi32>
    %cst_38 = arith.constant 0.000000e+00 : f32
    %114 = vector.shape_cast %83 : vector<1x256xf32> to vector<1x256xf32>
    %115 = vector.broadcast %114 : vector<1x256xf32> to vector<16x256xf32>
    %116 = vector.broadcast %cst_38 : f32 to vector<16x256xf32>
    %117 = arith.select %113, %115, %116 : vector<16x256xi1>, vector<16x256xf32>
    %118 = vector.shape_cast %85 : vector<1x256xf32> to vector<1x256xf32>
    %119 = vector.broadcast %118 : vector<1x256xf32> to vector<16x256xf32>
    %120 = arith.select %110, %119, %117 : vector<16x256xi1>, vector<16x256xf32>
    %cst_39 = arith.constant dense<0.000000e+00> : vector<64x256xf32>
    %121 = tpu.matmul %25, %120, %cst_39 {dimension_numbers = #tpu.dot_dimension_numbers<[1], [0], [0], [1], [0, 0, 1, 1], [], []>} : vector<64x16xf32>, vector<16x256xf32>, vector<64x256xf32> -> vector<64x256xf32>
    %122 = vector.shape_cast %121 : vector<64x256xf32> to vector<4x16x256xf32>
    %123 = vector.shape_cast %107 : vector<16x256xf32> to vector<1x16x256xf32>
    %124 = vector.broadcast %123 : vector<1x16x256xf32> to vector<4x16x256xf32>
    %125 = arith.mulf %122, %124 : vector<4x16x256xf32>
    %cst_40 = arith.constant dense<0.000000e+00> : vector<4x256xf32>
    %126 = vector.multi_reduction <add>, %125, %cst_40 [1] : vector<4x16x256xf32> to vector<4x256xf32>
    %c0_41 = arith.constant 0 : index
    %c0_42 = arith.constant 0 : index
    %c0_43 = arith.constant 0 : index
    %127 = vector.load %arg8[%c0_41, %c0_42, %c0_43] : memref<2x4x256xf32, #tpu.memory_space<vmem>>, vector<1x4x256xf32>
    %128 = vector.shape_cast %127 : vector<1x4x256xf32> to vector<4x256xf32>
    %129 = vector.shape_cast %126 : vector<4x256xf32> to vector<1x4x256xf32>
    tpu.vector_store %arg8[%c0_41, %c0_42, %c0_43], %129 {strides = array<i32>} : memref<2x4x256xf32, #tpu.memory_space<vmem>>, vector<1x4x256xf32>,
    %130 = vector.extract_strided_slice %13 {offsets = [1, 0], sizes = [1, 1], strides = [1, 1]} : vector<2x8xf32> to vector<1x1xf32>
    %131 = vector.extract_strided_slice %13 {offsets = [1, 1], sizes = [1, 1], strides = [1, 1]} : vector<2x8xf32> to vector<1x1xf32>
    %132 = vector.extract_strided_slice %13 {offsets = [1, 2], sizes = [1, 1], strides = [1, 1]} : vector<2x8xf32> to vector<1x1xf32>
    %133 = vector.extract_strided_slice %13 {offsets = [1, 3], sizes = [1, 1], strides = [1, 1]} : vector<2x8xf32> to vector<1x1xf32>
    %134 = vector.extract_strided_slice %13 {offsets = [1, 4], sizes = [1, 1], strides = [1, 1]} : vector<2x8xf32> to vector<1x1xf32>
    %135 = vector.extract_strided_slice %13 {offsets = [1, 5], sizes = [1, 1], strides = [1, 1]} : vector<2x8xf32> to vector<1x1xf32>
    %c1 = arith.constant 1 : index
    %c0_44 = arith.constant 0 : index
    %c0_45 = arith.constant 0 : index
    %136 = vector.load %arg6[%c1, %c0_44, %c0_45] : memref<2x64x16xf32, #tpu.memory_space<vmem>>, vector<1x64x16xf32>
    %137 = vector.shape_cast %136 : vector<1x64x16xf32> to vector<64x16xf32>
    %138 = tpu.iota {dimensions = array<i32: 1>} : vector<1x256xi32>
    %c0_i32_46 = arith.constant 0 : i32
    %139 = vector.broadcast %c0_i32_46 : i32 to vector<1x256xi32>
    %140 = arith.addi %138, %139 : vector<1x256xi32>
    %c4_i32_47 = arith.constant 4 : i32
    %141 = vector.broadcast %c4_i32_47 : i32 to vector<1x256xi32>
    %142 = arith.shrsi %140, %141 : vector<1x256xi32>
    %143 = arith.sitofp %142 : vector<1x256xi32> to vector<1x256xf32>
    %c15_i32_48 = arith.constant 15 : i32
    %144 = vector.broadcast %c15_i32_48 : i32 to vector<1x256xi32>
    %145 = arith.andi %140, %144 : vector<1x256xi32>
    %146 = arith.sitofp %145 : vector<1x256xi32> to vector<1x256xf32>
    %cst_49 = arith.constant 2.000000e+00 : f32
    %147 = vector.broadcast %cst_49 : f32 to vector<1x256xf32>
    %148 = arith.mulf %147, %146 : vector<1x256xf32>
    %cst_50 = arith.constant 1.000000e+00 : f32
    %149 = vector.broadcast %cst_50 : f32 to vector<1x256xf32>
    %150 = arith.addf %148, %149 : vector<1x256xf32>
    %cst_51 = arith.constant 1.600000e+01 : f32
    %151 = vector.broadcast %cst_51 : f32 to vector<1x256xf32>
    %152 = arith.divf %150, %151 : vector<1x256xf32>
    %cst_52 = arith.constant 1.000000e+00 : f32
    %153 = vector.broadcast %cst_52 : f32 to vector<1x256xf32>
    %154 = arith.subf %152, %153 : vector<1x256xf32>
    %cst_53 = arith.constant 2.000000e+00 : f32
    %155 = vector.broadcast %cst_53 : f32 to vector<1x256xf32>
    %156 = arith.mulf %155, %143 : vector<1x256xf32>
    %cst_54 = arith.constant 1.000000e+00 : f32
    %157 = vector.broadcast %cst_54 : f32 to vector<1x256xf32>
    %158 = arith.addf %156, %157 : vector<1x256xf32>
    %cst_55 = arith.constant 1.600000e+01 : f32
    %159 = vector.broadcast %cst_55 : f32 to vector<1x256xf32>
    %160 = arith.divf %158, %159 : vector<1x256xf32>
    %cst_56 = arith.constant 1.000000e+00 : f32
    %161 = vector.broadcast %cst_56 : f32 to vector<1x256xf32>
    %162 = arith.subf %160, %161 : vector<1x256xf32>
    %163 = vector.broadcast %130 : vector<1x1xf32> to vector<1x256xf32>
    %164 = arith.mulf %163, %154 : vector<1x256xf32>
    %165 = vector.broadcast %131 : vector<1x1xf32> to vector<1x256xf32>
    %166 = arith.mulf %165, %162 : vector<1x256xf32>
    %167 = arith.addf %164, %166 : vector<1x256xf32>
    %168 = vector.broadcast %132 : vector<1x1xf32> to vector<1x256xf32>
    %169 = arith.addf %167, %168 : vector<1x256xf32>
    %170 = vector.broadcast %133 : vector<1x1xf32> to vector<1x256xf32>
    %171 = arith.mulf %170, %154 : vector<1x256xf32>
    %172 = vector.broadcast %134 : vector<1x1xf32> to vector<1x256xf32>
    %173 = arith.mulf %172, %162 : vector<1x256xf32>
    %174 = arith.addf %171, %173 : vector<1x256xf32>
    %175 = vector.broadcast %135 : vector<1x1xf32> to vector<1x256xf32>
    %176 = arith.addf %174, %175 : vector<1x256xf32>
    %cst_57 = arith.constant 1.000000e+00 : f32
    %177 = vector.broadcast %cst_57 : f32 to vector<1x256xf32>
    %178 = arith.addf %169, %177 : vector<1x256xf32>
    %cst_58 = arith.constant 1.600000e+01 : f32
    %179 = vector.broadcast %cst_58 : f32 to vector<1x256xf32>
    %180 = arith.mulf %178, %179 : vector<1x256xf32>
    %cst_59 = arith.constant 1.000000e+00 : f32
    %181 = vector.broadcast %cst_59 : f32 to vector<1x256xf32>
    %182 = arith.subf %180, %181 : vector<1x256xf32>
    %cst_60 = arith.constant 5.000000e-01 : f32
    %183 = vector.broadcast %cst_60 : f32 to vector<1x256xf32>
    %184 = arith.mulf %182, %183 : vector<1x256xf32>
    %cst_61 = arith.constant 1.000000e+00 : f32
    %185 = vector.broadcast %cst_61 : f32 to vector<1x256xf32>
    %186 = arith.addf %176, %185 : vector<1x256xf32>
    %cst_62 = arith.constant 1.600000e+01 : f32
    %187 = vector.broadcast %cst_62 : f32 to vector<1x256xf32>
    %188 = arith.mulf %186, %187 : vector<1x256xf32>
    %cst_63 = arith.constant 1.000000e+00 : f32
    %189 = vector.broadcast %cst_63 : f32 to vector<1x256xf32>
    %190 = arith.subf %188, %189 : vector<1x256xf32>
    %cst_64 = arith.constant 5.000000e-01 : f32
    %191 = vector.broadcast %cst_64 : f32 to vector<1x256xf32>
    %192 = arith.mulf %190, %191 : vector<1x256xf32>
    %193 = math.floor %184 : vector<1x256xf32>
    %194 = math.floor %192 : vector<1x256xf32>
    %195 = arith.subf %184, %193 : vector<1x256xf32>
    %cst_65 = arith.constant 1.000000e+00 : f32
    %196 = vector.broadcast %cst_65 : f32 to vector<1x256xf32>
    %197 = arith.subf %196, %195 : vector<1x256xf32>
    %198 = arith.subf %192, %194 : vector<1x256xf32>
    %cst_66 = arith.constant 1.000000e+00 : f32
    %199 = vector.broadcast %cst_66 : f32 to vector<1x256xf32>
    %200 = arith.subf %199, %198 : vector<1x256xf32>
    %201 = arith.fptosi %193 : vector<1x256xf32> to vector<1x256xi32>
    %202 = arith.fptosi %194 : vector<1x256xf32> to vector<1x256xi32>
    %c1_i32_67 = arith.constant 1 : i32
    %203 = vector.broadcast %c1_i32_67 : i32 to vector<1x256xi32>
    %204 = arith.addi %201, %203 : vector<1x256xi32>
    %c1_i32_68 = arith.constant 1 : i32
    %205 = vector.broadcast %c1_i32_68 : i32 to vector<1x256xi32>
    %206 = arith.addi %202, %205 : vector<1x256xi32>
    %207 = vector.broadcast %16 : vector<16x1xi32> to vector<16x256xi32>
    %208 = vector.broadcast %202 : vector<1x256xi32> to vector<16x256xi32>
    %209 = arith.cmpi eq, %207, %208 : vector<16x256xi32>
    %210 = vector.broadcast %16 : vector<16x1xi32> to vector<16x256xi32>
    %211 = vector.broadcast %206 : vector<1x256xi32> to vector<16x256xi32>
    %212 = arith.cmpi eq, %210, %211 : vector<16x256xi32>
    %cst_69 = arith.constant 0.000000e+00 : f32
    %213 = vector.shape_cast %198 : vector<1x256xf32> to vector<1x256xf32>
    %214 = vector.broadcast %213 : vector<1x256xf32> to vector<16x256xf32>
    %215 = vector.broadcast %cst_69 : f32 to vector<16x256xf32>
    %216 = arith.select %212, %214, %215 : vector<16x256xi1>, vector<16x256xf32>
    %217 = vector.shape_cast %200 : vector<1x256xf32> to vector<1x256xf32>
    %218 = vector.broadcast %217 : vector<1x256xf32> to vector<16x256xf32>
    %219 = arith.select %209, %218, %216 : vector<16x256xi1>, vector<16x256xf32>
    %220 = vector.broadcast %17 : vector<16x1xi32> to vector<16x256xi32>
    %221 = vector.broadcast %201 : vector<1x256xi32> to vector<16x256xi32>
    %222 = arith.cmpi eq, %220, %221 : vector<16x256xi32>
    %223 = vector.broadcast %17 : vector<16x1xi32> to vector<16x256xi32>
    %224 = vector.broadcast %204 : vector<1x256xi32> to vector<16x256xi32>
    %225 = arith.cmpi eq, %223, %224 : vector<16x256xi32>
    %cst_70 = arith.constant 0.000000e+00 : f32
    %226 = vector.shape_cast %195 : vector<1x256xf32> to vector<1x256xf32>
    %227 = vector.broadcast %226 : vector<1x256xf32> to vector<16x256xf32>
    %228 = vector.broadcast %cst_70 : f32 to vector<16x256xf32>
    %229 = arith.select %225, %227, %228 : vector<16x256xi1>, vector<16x256xf32>
    %230 = vector.shape_cast %197 : vector<1x256xf32> to vector<1x256xf32>
    %231 = vector.broadcast %230 : vector<1x256xf32> to vector<16x256xf32>
    %232 = arith.select %222, %231, %229 : vector<16x256xi1>, vector<16x256xf32>
    %cst_71 = arith.constant dense<0.000000e+00> : vector<64x256xf32>
    %233 = tpu.matmul %137, %232, %cst_71 {dimension_numbers = #tpu.dot_dimension_numbers<[1], [0], [0], [1], [0, 0, 1, 1], [], []>} : vector<64x16xf32>, vector<16x256xf32>, vector<64x256xf32> -> vector<64x256xf32>
    %234 = vector.shape_cast %233 : vector<64x256xf32> to vector<4x16x256xf32>
    %235 = vector.shape_cast %219 : vector<16x256xf32> to vector<1x16x256xf32>
    %236 = vector.broadcast %235 : vector<1x16x256xf32> to vector<4x16x256xf32>
    %237 = arith.mulf %234, %236 : vector<4x16x256xf32>
    %cst_72 = arith.constant dense<0.000000e+00> : vector<4x256xf32>
    %238 = vector.multi_reduction <add>, %237, %cst_72 [1] : vector<4x16x256xf32> to vector<4x256xf32>
    %c1_73 = arith.constant 1 : index
    %c0_74 = arith.constant 0 : index
    %c0_75 = arith.constant 0 : index
    %239 = vector.load %arg8[%c1_73, %c0_74, %c0_75] : memref<2x4x256xf32, #tpu.memory_space<vmem>>, vector<1x4x256xf32>
    %240 = vector.shape_cast %239 : vector<1x4x256xf32> to vector<4x256xf32>
    %241 = vector.shape_cast %238 : vector<4x256xf32> to vector<1x4x256xf32>
    tpu.vector_store %arg8[%c1_73, %c0_74, %c0_75], %241 {strides = array<i32>} : memref<2x4x256xf32, #tpu.memory_space<vmem>>, vector<1x4x256xf32>,
    return
  }
  func.func @transform_0(%arg0: i32) -> (i32, i32, i32) {
    %c0_i32 = arith.constant 0 : i32
    %c0_i32_0 = arith.constant 0 : i32
    %c0_i32_1 = arith.constant 0 : i32
    return %arg0, %c0_i32, %c0_i32_0 : i32, i32, i32
  }
  func.func @transform_1(%arg0: i32) -> (i32, i32) {
    %c0_i32 = arith.constant 0 : i32
    %c0_i32_0 = arith.constant 0 : i32
    %c0_i32_1 = arith.constant 0 : i32
    return %c0_i32, %c0_i32_0 : i32, i32
  }
  func.func @transform_2(%arg0: i32) -> (i32, i32) {
    %c0_i32 = arith.constant 0 : i32
    %c0_i32_0 = arith.constant 0 : i32
    %c0_i32_1 = arith.constant 0 : i32
    return %c0_i32, %c0_i32_0 : i32, i32
  }
  func.func @transform_3(%arg0: i32) -> (i32, i32) {
    %c0_i32 = arith.constant 0 : i32
    %c0_i32_0 = arith.constant 0 : i32
    %c0_i32_1 = arith.constant 0 : i32
    return %c0_i32, %c0_i32_0 : i32, i32
  }
  func.func @transform_4(%arg0: i32) -> (i32, i32) {
    %c0_i32 = arith.constant 0 : i32
    %c0_i32_0 = arith.constant 0 : i32
    %c0_i32_1 = arith.constant 0 : i32
    return %c0_i32, %c0_i32_0 : i32, i32
  }
  func.func @transform_5(%arg0: i32) -> (i32, i32, i32) {
    %c0_i32 = arith.constant 0 : i32
    %c0_i32_0 = arith.constant 0 : i32
    %c0_i32_1 = arith.constant 0 : i32
    return %arg0, %c0_i32, %c0_i32_0 : i32, i32, i32
  }
  func.func @transform_6(%arg0: i32) -> (i32, i32, i32) {
    %c0_i32 = arith.constant 0 : i32
    %c0_i32_0 = arith.constant 0 : i32
    %c0_i32_1 = arith.constant 0 : i32
    return %arg0, %c0_i32, %c0_i32_0 : i32, i32, i32
  }
  func.func @transform_7(%arg0: i32) -> (i32, i32, i32) {
    %c0_i32 = arith.constant 0 : i32
    %c0_i32_0 = arith.constant 0 : i32
    %c0_i32_1 = arith.constant 0 : i32
    return %arg0, %c0_i32, %c0_i32_0 : i32, i32, i32
  }
}

</mosaic_0001>

<bundles_post_ra>
// kernel: tpu_custom_call.1
= control target key start
LH: loop header
LB: loop body
LE: loop exit
PB: predicated region body
PF: predicated region fallthrough
CT: control target
= control target key end

     0   :  { %13 = vsyncpa [#allocation3], 0  ;;  %s1306_s0 = inlined_call_operand.vmem [shape: f32[2,1,64], index: 0, kind: input, shape index: {}]   ;;  %s1307_s1 = inlined_call_operand.vmem [shape: f32[64,32], index: 1, kind: input, shape index: {}]   ;;  %s1308_s2 = inlined_call_operand.vmem [shape: f32[1,32], index: 2, kind: input, shape index: {}]   ;;  %s1309_s3 = inlined_call_operand.vmem [shape: f32[32,8], index: 3, kind: input, shape index: {}]   ;;  %s1310_s4 = inlined_call_operand.vmem [shape: f32[1,8], index: 4, kind: input, shape index: {}]   ;;  %s1311_s5 = inlined_call_operand.vmem [shape: f32[2,64,16], index: 5, kind: input, shape index: {}]   ;;  %s1312_s6 = inlined_call_operand.hbm [shape: f32[2,1,8], index: 6, kind: output, shape index: {0}]   ;;  %s1313_s7 = inlined_call_operand.hbm [shape: f32[2,4,256], index: 7, kind: output, shape index: {1}]  }
   0x1   :  { %v36_v0 = vld [vmem:[%s1307_s1 + $0x38] sm:$0xff]  ;;  %v35_v1 = vld [vmem:[%s1307_s1 + $0x30] sm:$0xff]  ;;  %v34_v2 = vld [vmem:[%s1307_s1 + $0x28] sm:$0xff] }
   0x2   :  { %58 = vmatpush.msra.mxu0 %v36_v0  ;;  %v27_v3 = vld [vmem:[%s1306_s0] sm:$0x1]  ;;  %v28_v4 = vld [vmem:[%s1306_s0 + $0x1] sm:$0x1]  ;;  %v74_v5 = vld [vmem:[%s1309_s3 + $0x18] sm:$0xff] }
   0x3   :  { %43 = vst [vmem:[#allocation1] ss:$9 sm:$0xff] %v27_v3  ;;  %v33_v6 = vld [vmem:[%s1307_s1 + $0x20] sm:$0xff]  ;;  %95 = vmatpush.msra.mxu1 %v74_v5 }
   0x4   :  { %59 = vmatpush.msra.mxu0 %v35_v1  ;;  %45 = vst [vmem:[#allocation1 + $0x1] ss:$9 sm:$0xff] %v28_v4 }
   0x6   :  { %60 = vmatpush.msra.mxu0 %v34_v2 }
   0x7   :  { %14 = vsyncpa [#allocation5], 0  ;;  %v32_v7 = vld [vmem:[%s1307_s1 + $0x18] sm:$0xff]  ;;  %v31_v8 = vld [vmem:[%s1307_s1 + $0x10] sm:$0xff]  ;;  %vm47_vm0 = vcmask 523264   ;;  %vm79_vm1 = vcmask 261120   ;;  %v109_v29 = vlaneseq }
   0x8   :  { %61 = vmatpush.msra.mxu0 %v33_v6  ;;  %v30_v9 = vld [vmem:[%s1307_s1 + $0x8] sm:$0xff]  ;;  %v29_v10 = vld [vmem:[%s1307_s1] sm:$0xff]  ;;  %v73_v12 = vld [vmem:[%s1309_s3 + $0x10] sm:$0xff]  ;;  %v926_v19 = vmov 4   ;;  %v927_v20 = vmov 2   ;;  %v928_v21 = vmov 0  }
   0x9   :  { %96 = vmatpush.msra.mxu1 %v73_v12  ;;  %v72_v13 = vld [vmem:[%s1309_s3 + $0x8] sm:$0xff]  ;;  %v71_v14 = vld [vmem:[%s1309_s3] sm:$0xff]  ;;  %867 = vset.pattern.permute.xlu2 %v926_v19  ;;  %vm106_vm2 = vcmask 57344   ;;  %v929_v26 = vmov 5   ;;  %v930_v27 = vmov 3   ;;  %v931_v28 = vmov 1  }
   0xa   :  { %62 = vmatpush.msra.mxu0 %v32_v7  ;;  %v870_v15 = vld [vmem:[%s1308_s2] ss:$0 sm:$0xff]  ;;  %865 = vset.pattern.permute.xlu1 %v927_v20  ;;  %v932_v30 = vmov 16.0   ;;  %v121_v31 = vand.u32 127, %v109_v29  ;;  %vm278_vm4 = vcmask 130048   ;;  %s760_s11 = sshll.u32 %s1312_s6, 4  ;;  %s761_s11 = int_to_ptr.hbm [resolvable:$true] %s760_s11 }
   0xb   :  { %v46_v11 = vld [vmem:[#allocation1] sm:$0xff]  ;;  %97 = vmatpush.msra.mxu1 %v72_v13  ;;  %863 = vset.pattern.permute.xlu0 %v928_v21  ;;  %872 = vrcp.f32 %v932_v30  ;;  %s933_s12 = smov [#allocation2]   ;;  %s934_s14 = smov 16  }
   0xc   :  { %63 = vmatpush.msra.mxu0 %v31_v8  ;;  %v871_v22 = vld [vmem:[%s1310_s4] ss:$0 sm:$0xff]  ;;  %v122_v33 = vadd.s32 128, %v121_v31  ;;  %v123_v35 = vshra.s32 %v121_v31, 4  ;;  %v127_v37 = vand.u32 15, %v121_v31  ;;  %s758_s13 = sshll.u32 %s933_s12, 4  ;;  %s759_s13 = int_to_ptr.vmem [resolvable:$true] %s758_s13 }
   0xd   :  { %98 = vmatpush.msra.mxu1 %v71_v14  ;;  %s935_s15 = smov 1   ;;  %s773_s0 = sshll.u32 %s1313_s7, 4  ;;  %s774_s0 = int_to_ptr.hbm [resolvable:$true] %s773_s0 }
   0xe   :  { %64 = vmatpush.msra.mxu0 %v30_v9  ;;  %v124_v36 = vshra.s32 %v122_v33, 4  ;;  %v128_v38 = vand.u32 15, %v122_v33  ;;  %v125_v40 = vcvt.s32.f32 %v123_v35  ;;  %v129_v42 = vcvt.s32.f32 %v127_v37  ;;  %s937_s18 = smov 128   ;;  %s938_s19 = smov 8  }
  0x10   :  { %65 = vmatpush.msra.mxu0 %v29_v10  ;;  %v126_v41 = vcvt.s32.f32 %v124_v36  ;;  %v130_v43 = vcvt.s32.f32 %v128_v38  ;;  %v146_v45 = vmul.f32 2.0, %v125_v40  ;;  %v131_v47 = vmul.f32 2.0, %v129_v42 }
  0x11   :  { %790 = vmatmul.msk.f32.vlgmr.msra.gmra.mxu0 %vm47_vm0, %v46_v11  ;;  %v873_v32 = vpop.eup %872 }
  0x12   :  { %v136_v34 = vmul.f32 16.0, %v873_v32  ;;  %v147_v46 = vmul.f32 2.0, %v126_v41  ;;  %v132_v48 = vmul.f32 2.0, %v130_v43  ;;  %vm140_vm3 = vweird.f32 %v873_v32 }
  0x13   :  { %v148_v50 = vadd.f32 1.0, %v146_v45  ;;  %v133_v52 = vadd.f32 1.0, %v131_v47 }
  0x14   :  { %v137_v39 = vsub.f32 1.0, %v136_v34  ;;  %v149_v51 = vadd.f32 1.0, %v147_v46  ;;  %v134_v53 = vadd.f32 1.0, %v132_v48  ;;  %v1029_v34 = vshrl.u32 %v109_v29, 7 }
  0x16   :  { %v138_v44 = vmul.f32 %v873_v32, %v137_v39  ;;  %v1032_v43 = vadd.s32 8, %v1029_v34 }
  0x18   :  { %v139_v49 = vadd.f32 %v873_v32, %v138_v44 }
  0x1a   :  { %v141_v54 = vsel %vm140_vm3, %v873_v32, %v139_v49 }
  0x1b   :  { %v150_v57 = vmul.f32 %v148_v50, %v141_v54  ;;  %v151_v58 = vmul.f32 %v149_v51, %v141_v54  ;;  %v142_v59 = vmul.f32 %v141_v54, %v133_v52  ;;  %v143_v60 = vmul.f32 %v141_v54, %v134_v53 }
  0x1d   :  { %v794_v62 = vadd.f32 -1.0, %v150_v57  ;;  %v795_v63 = vadd.f32 -1.0, %v151_v58  ;;  %v792_v0 = vadd.f32 -1.0, %v142_v59  ;;  %v793_v1 = vadd.f32 -1.0, %v143_v60 }
  0x8e   :  { %v67_v16 = vpop.f32.mrf.mxu0 }
  0x8f   :  { %v68_v17 = vadd.f32 %v870_v15, %v67_v16 }
  0x91   :  { %v70_v18 = vmax.f32 %v68_v17, 0.0 }
  0x93   :  { %791 = vmatmul.msk.f32.vlgmr.msra.gmra.mxu1 %vm79_vm1, %v70_v18 }
 0x110   :  { %v100_v23 = vpop.f32.mrf.mxu1 }
 0x111   :  { %v101_v24 = vadd.f32 %v871_v22, %v100_v23 }
 0x113   :  { %181 = vperm.xlu2 %867, %v101_v24   ;;  %169 = vperm.xlu1 %865, %v101_v24   ;;  %v104_v25 = vrot.slane %v101_v24, 1  ;;  %107 = vst.msk [vmem:[#allocation2] sm:$0x1] %vm106_vm2, %v101_v24 }
 0x114   :  { %155 = vperm.xlu0 %863, %v101_v24  }
 0x115   :  { %108 = vst.msk [vmem:[#allocation2 + $0x1] sm:$0x1] %vm106_vm2, %v104_v25 }
 0x116   :  { %766 = dma.vmem_to_hbm [thread:$0]  %s759_s13, 32, %s761_s11, [#allocation3], %s934_s14, %s934_s14, %s935_s15  }
 0x11b   :  { %868 = vset.pattern.permute.xlu2 %v929_v26  ;;  %866 = vset.pattern.permute.xlu1 %v930_v27 }
 0x11c   :  { %864 = vset.pattern.permute.xlu0 %v931_v28  ;;  %189 = vperm.xlu2 %868, %v101_v24  }
 0x11d   :  { %175 = vperm.xlu1 %866, %v101_v24   ;;  %161 = vperm.xlu0 %864, %v101_v24  }
 0x125   :  { %869 = vset.pattern.permute.xlu0 %v929_v26 }
 0x16d   :  { %v182_v61 = vpop.permute.xlu2 %181 }
 0x16e   :  { %v184_v2 = vmul.f32 %v794_v62, %v182_v61  ;;  %v185_v3 = vmul.f32 %v795_v63, %v182_v61 }
 0x176   :  { %v190_v16 = vpop.permute.xlu2 %189 }
 0x185   :  { %v170_v55 = vpop.permute.xlu1 %169 }
 0x186   :  { %v156_v56 = vpop.permute.xlu0 %155 }
 0x187   :  { %v158_v4 = vmul.f32 %v792_v0, %v156_v56  ;;  %v159_v5 = vmul.f32 %v793_v1, %v156_v56 }
 0x18f   :  { %v176_v6 = vpop.permute.xlu1 %175  ;;  %v162_v7 = vpop.permute.xlu0 %161 }
 0x190   :  { %v178_v8 = vmul.f32 %v792_v0, %v176_v6  ;;  %v179_v9 = vmul.f32 %v793_v1, %v176_v6  ;;  %v164_v10 = vmul.f32 %v794_v62, %v162_v7  ;;  %v165_v11 = vmul.f32 %v795_v63, %v162_v7  ;;  %v818_v7 = vld [vmem:[%s1311_s5 + $0x50] sm:$0xff] }
 0x192   :  { %v186_v12 = vadd.f32 %v184_v2, %v178_v8  ;;  %v187_v13 = vadd.f32 %v185_v3, %v179_v9  ;;  %v166_v14 = vadd.f32 %v164_v10, %v158_v4  ;;  %v167_v15 = vadd.f32 %v165_v11, %v159_v5 }
 0x194   :  { %v192_v17 = vadd.f32 %v190_v16, %v186_v12  ;;  %v193_v18 = vadd.f32 %v190_v16, %v187_v13  ;;  %v172_v19 = vadd.f32 %v170_v55, %v166_v14  ;;  %v173_v20 = vadd.f32 %v170_v55, %v167_v15 }
 0x196   :  { %v202_v21 = vadd.f32 1.0, %v192_v17  ;;  %v203_v22 = vadd.f32 1.0, %v193_v18  ;;  %v194_v23 = vadd.f32 1.0, %v172_v19  ;;  %v195_v24 = vadd.f32 1.0, %v173_v20 }
 0x198   :  { %v204_v25 = vmul.f32 16.0, %v202_v21  ;;  %v205_v26 = vmul.f32 16.0, %v203_v22  ;;  %v196_v27 = vmul.f32 16.0, %v194_v23  ;;  %v197_v28 = vmul.f32 16.0, %v195_v24  ;;  %v112_v22 = vld [vmem:[%s1311_s5] sm:$0xff] }
 0x19a   :  { %v798_v30 = vadd.f32 -1.0, %v204_v25  ;;  %v799_v31 = vadd.f32 -1.0, %v205_v26  ;;  %v796_v32 = vadd.f32 -1.0, %v196_v27  ;;  %v797_v33 = vadd.f32 -1.0, %v197_v28 }
 0x19c   :  { %v208_v35 = vmul.f32 0.5, %v798_v30  ;;  %v209_v36 = vmul.f32 0.5, %v799_v31  ;;  %v200_v37 = vmul.f32 0.5, %v796_v32  ;;  %v201_v38 = vmul.f32 0.5, %v797_v33  ;;  %v816_v32 = vld [vmem:[%s1311_s5 + $0x40] sm:$0xff] }
 0x19e   :  { %v212_v39 = vfloor.f32 %v208_v35  ;;  %v213_v40 = vfloor.f32 %v209_v36  ;;  %v210_v41 = vfloor.f32 %v200_v37  ;;  %v211_v42 = vfloor.f32 %v201_v38 }
 0x1a0   :  { %v1034_v44 = vsub.f32 %v208_v35, %v212_v39  ;;  %v1036_v45 = vsub.f32 %v209_v36, %v213_v40  ;;  %v1038_v46 = vcvt.f32.s32 %v212_v39  ;;  %v1040_v47 = vcvt.f32.s32 %v213_v40 }
 0x1a1   :  { %v1042_v29 = vsub.f32 %v200_v37, %v210_v41  ;;  %v843_v48 = vcvt.f32.s32 %v210_v41  ;;  %v1044_v49 = vsub.f32 %v201_v38, %v211_v42  ;;  %v845_v50 = vcvt.f32.s32 %v211_v42 }
 0x1a2   :  { %v220_v51 = vsub.f32 1.0, %v1034_v44  ;;  %v1048_v52 = vadd.s32 1, %v1038_v46  ;;  %v500_v53 = vperm.slane %v1038_v46, 1  ;;  %v512_v54 = vperm.slane %v1034_v44, 1 }
 0x1a3   :  { %v216_v55 = vsub.f32 1.0, %v1042_v29  ;;  %v226_v56 = vadd.s32 1, %v843_v48  ;;  %v254_v57 = vperm.slane %v843_v48, 0  ;;  %v266_v58 = vperm.slane %v1042_v29, 0 }
 0x1a4   :  { %v217_v59 = vsub.f32 1.0, %v1044_v49  ;;  %v227_v60 = vadd.s32 1, %v845_v50  ;;  %v255_v61 = vperm.slane %v845_v50, 0  ;;  %v267_v62 = vperm.slane %v1044_v49, 0 }
 0x1a5   :  { %vm1057_vm5 = vcmp.eq.s32.totalorder %v1032_v43, %v254_v57  ;;  %v260_v0 = vperm.slane %v226_v56, 0  ;;  %v272_v1 = vperm.slane %v216_v55, 0  ;;  %v524_v2 = vperm.slane %v843_v48, 1 }
 0x1a6   :  { %vm1062_vm6 = vcmp.eq.s32.totalorder %v1032_v43, %v255_v61  ;;  %v261_v4 = vperm.slane %v227_v60, 0  ;;  %v273_v5 = vperm.slane %v217_v59, 0  ;;  %v530_v6 = vperm.slane %v226_v56, 1 }
 0x1a7   :  { %vm264_vm7 = vcmp.eq.s32.totalorder %v1032_v43, %v260_v0  ;;  %vm1068_vm8 = vcmp.eq.s32.totalorder %v1032_v43, %v524_v2  ;;  %v536_v8 = vperm.slane %v1042_v29, 1  ;;  %v542_v9 = vperm.slane %v216_v55, 1 }
 0x1a8   :  { %v270_v10 = vsel %vm264_vm7, %v266_v58, 0.0  ;;  %vm265_vm9 = vcmp.eq.s32.totalorder %v1032_v43, %v261_v4  ;;  %vm534_vm10 = vcmp.eq.s32.totalorder %v1032_v43, %v530_v6  ;;  %v525_v11 = vperm.slane %v845_v50, 1 }
 0x1a9   :  { %v276_v12 = vsel %vm1057_vm5, %v272_v1, %v270_v10  ;;  %v271_v13 = vsel %vm265_vm9, %v267_v62, 0.0  ;;  %v540_v14 = vsel %vm534_vm10, %v536_v8, 0.0  ;;  %v531_v15 = vperm.slane %v227_v60, 1  ;;  %v820_v10 = vld [vmem:[%s1311_s5 + $0x60] sm:$0xff] }
 0x1aa   :  { %317 = vmatpush.msra.mxu2 %v276_v12  ;;  %v277_v16 = vsel %vm1062_vm6, %v273_v5, %v271_v13  ;;  %v546_v17 = vsel %vm1068_vm8, %v542_v9, %v540_v14  ;;  %vm529_vm11 = vcmp.eq.s32.totalorder %v1032_v43, %v525_v11  ;;  %v537_v18 = vperm.slane %v1044_v49, 1  ;;  %v821_v12 = vld [vmem:[%s1311_s5 + $0x68] sm:$0xff]  ;;  %v118_v13 = vld [vmem:[%s1311_s5 + $0x30] sm:$0xff] }
 0x1ab   :  { %358 = vmatpush.msra.mxu3 %v277_v16  ;;  %586 = vmatpush.msrb.mxu1 %v546_v17  ;;  %vm535_vm12 = vcmp.eq.s32.totalorder %v1032_v43, %v531_v15  ;;  %v543_v19 = vperm.slane %v217_v59, 1  ;;  %vm256_vm13 = vcmp.eq.s32.totalorder %v1029_v34, %v254_v57  ;;  %vm262_vm14 = vcmp.eq.s32.totalorder %v1029_v34, %v260_v0  ;;  %v822_v14 = vld [vmem:[%s1311_s5 + $0x70] sm:$0xff]  ;;  %v823_v16 = vld [vmem:[%s1311_s5 + $0x78] sm:$0xff] }
 0x1ac   :  { %v541_v20 = vsel %vm535_vm12, %v537_v18, 0.0  ;;  %v268_v21 = vsel %vm262_vm14, %v266_v58, 0.0  ;;  %vm257_vm15 = vcmp.eq.s32.totalorder %v1029_v34, %v255_v61  ;;  %vm263_vm0 = vcmp.eq.s32.totalorder %v1029_v34, %v261_v4  ;;  %v113_v58 = vld [vmem:[%s1311_s5 + $0x8] sm:$0xff] }
 0x1ad   :  { %v547_v23 = vsel %vm529_vm11, %v543_v19, %v541_v20  ;;  %v274_v24 = vsel %vm256_vm13, %v272_v1, %v268_v21  ;;  %v269_v25 = vsel %vm263_vm0, %v267_v62, 0.0  ;;  %vm1092_vm1 = vcmp.eq.s32.totalorder %v1029_v34, %v524_v2 }
 0x1ae   :  { %627 = vmatpush.msrb.mxu0 %v547_v23  ;;  %318 = vmatpush.msra.mxu2 %v274_v24  ;;  %v275_v27 = vsel %vm257_vm15, %v273_v5, %v269_v25  ;;  %vm532_vm2 = vcmp.eq.s32.totalorder %v1029_v34, %v530_v6  ;;  %vm1098_vm3 = vcmp.eq.s32.totalorder %v1029_v34, %v525_v11  ;;  %v506_v30 = vperm.slane %v1048_v52, 1  ;;  %v117_v11 = vld [vmem:[%s1311_s5 + $0x28] sm:$0xff] }
 0x1af   :  { %359 = vmatpush.msra.mxu3 %v275_v27  ;;  %v538_v31 = vsel %vm532_vm2, %v536_v8, 0.0  ;;  %vm533_vm5 = vcmp.eq.s32.totalorder %v1029_v34, %v531_v15  ;;  %800 = vmatmul.msk.f32.vlgmr.msra.gmra.mxu2 %vm278_vm4, %v112_v22  ;;  %vm502_vm6 = vcmp.eq.s32.totalorder %v1029_v34, %v500_v53  ;;  %v518_v33 = vperm.slane %v220_v51, 1  ;;  %v819_v8 = vld [vmem:[%s1311_s5 + $0x58] sm:$0xff] }
 0x1b0   :  { %v544_v35 = vsel %vm1092_vm1, %v542_v9, %v538_v31  ;;  %v539_v36 = vsel %vm533_vm5, %v537_v18, 0.0  ;;  %808 = vmatmul.msk.f32.vlgmr.msra.gmra.mxu3 %vm278_vm4, %v112_v22  ;;  %840 = vmatpush.msrb.mxu2 %v547_v23  ;;  %vm508_vm7 = vcmp.eq.s32.totalorder %v1029_v34, %v506_v30  ;;  %v221_v37 = vsub.f32 1.0, %v1036_v45  ;;  %v116_v9 = vld [vmem:[%s1311_s5 + $0x20] sm:$0xff]  ;;  %v119_v15 = vld [vmem:[%s1311_s5 + $0x38] sm:$0xff] }
 0x1b1   :  { %587 = vmatpush.msrb.mxu1 %v544_v35  ;;  %v545_v38 = vsel %vm1098_vm3, %v543_v19, %v539_v36  ;;  %v514_v39 = vsel %vm508_vm7, %v512_v54, 0.0  ;;  %v229_v40 = vadd.s32 1, %v1040_v47  ;;  %v501_v41 = vperm.slane %v1040_v47, 1 }
 0x1b2   :  { %628 = vmatpush.msrb.mxu0 %v545_v38  ;;  %824 = vmatmul.msk.f32.vlgmr.msrb.gmra.mxu1 %vm278_vm4, %v816_v32  ;;  %v1125_v42 = vsel %vm502_vm6, %v518_v33, %v514_v39  ;;  %v513_v29 = vperm.slane %v1036_v45, 1  ;;  %v519_v48 = vperm.slane %v221_v37, 1  ;;  %v230_v49 = vperm.slane %v1038_v46, 0 }
 0x1b3   :  { %832 = vmatmul.msk.f32.vlgmr.msrb.gmra.mxu0 %vm278_vm4, %v816_v32  ;;  %841 = vmatpush.msrb.mxu2 %v545_v38  ;;  %vm1131_vm8 = vcmp.eq.s32.totalorder %v1029_v34, %v501_v41  ;;  %v507_v55 = vperm.slane %v229_v40, 1  ;;  %v236_v56 = vperm.slane %v1048_v52, 0  ;;  %v242_v57 = vperm.slane %v1034_v44, 0  ;;  %v114_v44 = vld [vmem:[%s1311_s5 + $0x10] sm:$0xff] }
 0x1b4   :  { %vm232_vm9 = vcmp.eq.s32.totalorder %v1029_v34, %v230_v49  ;;  %v248_v59 = vperm.slane %v220_v51, 0  ;;  %v231_v60 = vperm.slane %v1040_v47, 0  ;;  %v237_v61 = vperm.slane %v229_v40, 0  ;;  %v817_v47 = vld [vmem:[%s1311_s5 + $0x48] sm:$0xff] }
 0x1b5   :  { %vm509_vm10 = vcmp.eq.s32.totalorder %v1029_v34, %v507_v55  ;;  %vm238_vm11 = vcmp.eq.s32.totalorder %v1029_v34, %v236_v56  ;;  %v243_v52 = vperm.slane %v1036_v45, 0  ;;  %v249_v62 = vperm.slane %v221_v37, 0 }
 0x1b6   :  { %v515_v63 = vsel %vm509_vm10, %v513_v29, 0.0  ;;  %v244_v0 = vsel %vm238_vm11, %v242_v57, 0.0  ;;  %vm233_vm12 = vcmp.eq.s32.totalorder %v1029_v34, %v231_v60  ;;  %vm239_vm13 = vcmp.eq.s32.totalorder %v1029_v34, %v237_v61 }
 0x1b7   :  { %801 = vmatmul.msk.f32.gmra.mxu2 %vm278_vm4, %v113_v58  ;;  %v1155_v51 = vsel %vm1131_vm8, %v519_v48, %v515_v63  ;;  %v1157_v1 = vsel %vm232_vm9, %v248_v59, %v244_v0  ;;  %v245_v45 = vsel %vm239_vm13, %v243_v52, 0.0  ;;  %vm504_vm14 = vcmp.eq.s32.totalorder %v1032_v43, %v500_v53 }
 0x1b8   :  { %809 = vmatmul.msk.f32.gmra.mxu3 %vm278_vm4, %v113_v58  ;;  %v1163_v34 = vsel %vm233_vm12, %v249_v62, %v245_v45  ;;  %vm510_vm15 = vcmp.eq.s32.totalorder %v1032_v43, %v506_v30  ;;  %vm505_vm0 = vcmp.eq.s32.totalorder %v1032_v43, %v501_v41  ;;  %vm511_vm1 = vcmp.eq.s32.totalorder %v1032_v43, %v507_v55 }
 0x1b9   :  { %v516_v2 = vsel %vm510_vm15, %v512_v54, 0.0  ;;  %v517_v3 = vsel %vm511_vm1, %v513_v29, 0.0  ;;  %vm234_vm2 = vcmp.eq.s32.totalorder %v1032_v43, %v230_v49  ;;  %vm240_vm3 = vcmp.eq.s32.totalorder %v1032_v43, %v236_v56 }
 0x1ba   :  { %825 = vmatmul.msk.f32.gmra.mxu1 %vm278_vm4, %v817_v47  ;;  %v1173_v46 = vsel %vm504_vm14, %v518_v33, %v516_v2  ;;  %v1175_v53 = vsel %vm505_vm0, %v519_v48, %v517_v3  ;;  %v246_v4 = vsel %vm240_vm3, %v242_v57, 0.0  ;;  %vm235_vm5 = vcmp.eq.s32.totalorder %v1032_v43, %v231_v60 }
 0x1bb   :  { %833 = vmatmul.msk.f32.gmra.mxu0 %vm278_vm4, %v817_v47  ;;  %v1179_v5 = vsel %vm234_vm2, %v248_v59, %v246_v4  ;;  %vm241_vm6 = vcmp.eq.s32.totalorder %v1032_v43, %v237_v61  ;;  %v115_v43 = vld [vmem:[%s1311_s5 + $0x18] sm:$0xff]  ;;  %vm475_vm7 = vcmask 1041409   ;;  %vm477_vm8 = vcmask 1045509   ;;  %s936_s5 = smov [#allocation4]  }
 0x1bc   :  { %v247_v54 = vsel %vm241_vm6, %v243_v52, 0.0  ;;  %vm480_vm9 = vcmask 1042434   ;;  %vm482_vm10 = vcmask 1046534   ;;  %vm485_vm11 = vcmask 1043459   ;;  %s771_s6 = sshll.u32 %s936_s5, 4  ;;  %s772_s6 = int_to_ptr.vmem [resolvable:$true] %s771_s6 }
 0x1bd   :  { %v1185_v6 = vsel %vm235_vm5, %v249_v62, %v247_v54  ;;  %vm487_vm12 = vcmask 1047559  }
 0x1bf   :  { %802 = vmatmul.msk.f32.gmra.mxu2 %vm278_vm4, %v114_v44 }
 0x1c0   :  { %810 = vmatmul.msk.f32.gmra.mxu3 %vm278_vm4, %v114_v44 }
 0x1c2   :  { %826 = vmatmul.msk.f32.gmra.mxu1 %vm278_vm4, %v818_v7 }
 0x1c3   :  { %834 = vmatmul.msk.f32.gmra.mxu0 %vm278_vm4, %v818_v7 }
 0x1c7   :  { %803 = vmatmul.msk.f32.gmra.mxu2 %vm278_vm4, %v115_v43 }
 0x1c8   :  { %811 = vmatmul.msk.f32.gmra.mxu3 %vm278_vm4, %v115_v43 }
 0x1ca   :  { %827 = vmatmul.msk.f32.gmra.mxu1 %vm278_vm4, %v819_v8 }
 0x1cb   :  { %835 = vmatmul.msk.f32.gmra.mxu0 %vm278_vm4, %v819_v8 }
 0x1cf   :  { %804 = vmatmul.msk.f32.gmra.mxu2 %vm278_vm4, %v116_v9 }
 0x1d0   :  { %812 = vmatmul.msk.f32.gmra.mxu3 %vm278_vm4, %v116_v9 }
 0x1d2   :  { %828 = vmatmul.msk.f32.gmra.mxu1 %vm278_vm4, %v820_v10 }
 0x1d3   :  { %836 = vmatmul.msk.f32.gmra.mxu0 %vm278_vm4, %v820_v10 }
 0x1d7   :  { %805 = vmatmul.msk.f32.gmra.mxu2 %vm278_vm4, %v117_v11 }
 0x1d8   :  { %813 = vmatmul.msk.f32.gmra.mxu3 %vm278_vm4, %v117_v11 }
 0x1da   :  { %829 = vmatmul.msk.f32.gmra.mxu1 %vm278_vm4, %v821_v12 }
 0x1db   :  { %837 = vmatmul.msk.f32.gmra.mxu0 %vm278_vm4, %v821_v12 }
 0x1df   :  { %806 = vmatmul.msk.f32.gmra.mxu2 %vm278_vm4, %v118_v13 }
 0x1e0   :  { %814 = vmatmul.msk.f32.gmra.mxu3 %vm278_vm4, %v118_v13 }
 0x1e2   :  { %830 = vmatmul.msk.f32.gmra.mxu1 %vm278_vm4, %v822_v14 }
 0x1e3   :  { %838 = vmatmul.msk.f32.gmra.mxu0 %vm278_vm4, %v822_v14 }
 0x1e7   :  { %807 = vmatmul.msk.f32.gmra.mxu2 %vm278_vm4, %v119_v15 }
 0x1e8   :  { %815 = vmatmul.msk.f32.gmra.mxu3 %vm278_vm4, %v119_v15 }
 0x1ea   :  { %831 = vmatmul.msk.f32.gmra.mxu1 %vm278_vm4, %v823_v16 }
 0x1ef   :  { %839 = vmatmul.msk.f32.vlgmr.msrb.gmra.mxu2 %vm278_vm4, %v823_v16  ;;  %vm469_vm4 = vcmask 1043456  }
 0x22f   :  { %v589_v17 = vpop.f32.mrf.mxu1 }
 0x230   :  { %v630_v18 = vpop.f32.mrf.mxu0  ;;  %v654_v22 = vmul.f32 %v589_v17, %v1125_v42 }
 0x231   :  { %v655_v25 = vmul.f32 %v630_v18, %v1155_v51 }
 0x232   :  { %v320_v19 = vpop.f32.mrf.mxu2 }
 0x233   :  { %v361_v20 = vpop.f32.mrf.mxu3  ;;  %v385_v30 = vmul.f32 %v320_v19, %v1157_v1 }
 0x234   :  { %v386_v35 = vmul.f32 %v361_v20, %v1163_v34 }
 0x237   :  { %v592_v21 = vpop.f32.mrf.mxu1 }
 0x238   :  { %v656_v23 = vmul.f32 %v592_v21, %v1173_v46  ;;  %v633_v24 = vpop.f32.mrf.mxu0 }
 0x239   :  { %v657_v26 = vmul.f32 %v633_v24, %v1175_v53 }
 0x23a   :  { %v670_v27 = vadd.f32 %v656_v23, %v654_v22  ;;  %v323_v28 = vpop.f32.mrf.mxu2 }
 0x23b   :  { %v677_v31 = vadd.f32 %v657_v26, %v655_v25  ;;  %v387_v32 = vmul.f32 %v323_v28, %v1179_v5  ;;  %v364_v33 = vpop.f32.mrf.mxu3 }
 0x23c   :  { %v671_v36 = vrot.slane %v670_v27, 4  ;;  %v388_v37 = vmul.f32 %v364_v33, %v1185_v6 }
 0x23d   :  { %v678_v38 = vrot.slane %v677_v31, 4  ;;  %v401_v39 = vadd.f32 %v387_v32, %v385_v30 }
 0x23e   :  { %v672_v40 = vadd.f32 %v671_v36, %v670_v27  ;;  %v408_v41 = vadd.f32 %v388_v37, %v386_v35 }
 0x23f   :  { %v679_v29 = vadd.f32 %v678_v38, %v677_v31  ;;  %v402_v48 = vrot.slane %v401_v39, 4  ;;  %v595_v49 = vpop.f32.mrf.mxu1 }
 0x240   :  { %v673_v50 = vrot.slane %v672_v40, 2  ;;  %v409_v55 = vrot.slane %v408_v41, 4  ;;  %v636_v56 = vpop.f32.mrf.mxu0  ;;  %v658_v43 = vmul.f32 %v595_v49, %v1125_v42 }
 0x241   :  { %v680_v57 = vrot.slane %v679_v29, 2  ;;  %v403_v58 = vadd.f32 %v402_v48, %v401_v39  ;;  %v659_v12 = vmul.f32 %v636_v56, %v1155_v51 }
 0x242   :  { %v674_v59 = vadd.f32 %v673_v50, %v672_v40  ;;  %v410_v60 = vadd.f32 %v409_v55, %v408_v41  ;;  %v326_v61 = vpop.f32.mrf.mxu2 }
 0x243   :  { %v681_v52 = vadd.f32 %v680_v57, %v679_v29  ;;  %v404_v62 = vrot.slane %v403_v58, 2  ;;  %v367_v63 = vpop.f32.mrf.mxu3  ;;  %v389_v15 = vmul.f32 %v326_v61, %v1157_v1 }
 0x244   :  { %v411_v0 = vrot.slane %v410_v60, 2  ;;  %v675_v47 = vrot.slane %v674_v59, 1  ;;  %v390_v19 = vmul.f32 %v367_v63, %v1163_v34 }
 0x245   :  { %v682_v45 = vrot.slane %v681_v52, 1  ;;  %v405_v2 = vadd.f32 %v404_v62, %v403_v58 }
 0x246   :  { %v412_v3 = vadd.f32 %v411_v0, %v410_v60  ;;  %v676_v10 = vadd.f32 %v675_v47, %v674_v59 }
 0x247   :  { %v683_v4 = vadd.f32 %v682_v45, %v681_v52  ;;  %v598_v44 = vpop.f32.mrf.mxu1  ;;  %v406_v54 = vrot.slane %v405_v2, 1 }
 0x248   :  { %v413_v7 = vrot.slane %v412_v3, 1  ;;  %v660_v8 = vmul.f32 %v598_v44, %v1173_v46  ;;  %v639_v9 = vpop.f32.mrf.mxu0 }
 0x249   :  { %v734_v11 = vrot.slane %v683_v4, 4  ;;  %v661_v13 = vmul.f32 %v639_v9, %v1175_v53  ;;  %v407_v23 = vadd.f32 %v406_v54, %v405_v2 }
 0x24a   :  { %v414_v14 = vadd.f32 %v413_v7, %v412_v3  ;;  %v684_v16 = vadd.f32 %v660_v8, %v658_v43  ;;  %v329_v17 = vpop.f32.mrf.mxu2 }
 0x24b   :  { %v1261_v18 = vsel %vm469_vm4, %v676_v10, %v734_v11  ;;  %v691_v20 = vadd.f32 %v661_v13, %v659_v12  ;;  %v391_v21 = vmul.f32 %v329_v17, %v1179_v5  ;;  %v370_v22 = vpop.f32.mrf.mxu3 }
 0x24c   :  { %v465_v24 = vrot.slane %v414_v14, 4  ;;  %v685_v25 = vrot.slane %v684_v16, 4  ;;  %v392_v26 = vmul.f32 %v370_v22, %v1185_v6 }
 0x24d   :  { %v692_v27 = vrot.slane %v691_v20, 4  ;;  %v415_v28 = vadd.f32 %v391_v21, %v389_v15 }
 0x24e   :  { %v1267_v30 = vsel %vm469_vm4, %v407_v23, %v465_v24  ;;  %v686_v31 = vadd.f32 %v685_v25, %v684_v16  ;;  %v422_v32 = vadd.f32 %v392_v26, %v390_v19 }
 0x24f   :  { %v693_v33 = vadd.f32 %v692_v27, %v691_v20  ;;  %v416_v35 = vrot.slane %v415_v28, 4  ;;  %v601_v36 = vpop.f32.mrf.mxu1 }
 0x250   :  { %v687_v37 = vrot.slane %v686_v31, 2  ;;  %v423_v38 = vrot.slane %v422_v32, 4  ;;  %v642_v39 = vpop.f32.mrf.mxu0  ;;  %v662_v47 = vmul.f32 %v601_v36, %v1125_v42 }
 0x251   :  { %v694_v40 = vrot.slane %v693_v33, 2  ;;  %v417_v41 = vadd.f32 %v416_v35, %v415_v28  ;;  %v663_v44 = vmul.f32 %v642_v39, %v1155_v51 }
 0x252   :  { %v688_v29 = vadd.f32 %v687_v37, %v686_v31  ;;  %v424_v48 = vadd.f32 %v423_v38, %v422_v32  ;;  %v332_v49 = vpop.f32.mrf.mxu2 }
 0x253   :  { %v695_v50 = vadd.f32 %v694_v40, %v693_v33  ;;  %v418_v55 = vrot.slane %v417_v41, 2  ;;  %v373_v56 = vpop.f32.mrf.mxu3  ;;  %v393_v43 = vmul.f32 %v332_v49, %v1157_v1 }
 0x254   :  { %v425_v57 = vrot.slane %v424_v48, 2  ;;  %v689_v58 = vrot.slane %v688_v29, 1  ;;  %v394_v8 = vmul.f32 %v373_v56, %v1163_v34 }
 0x255   :  { %v696_v59 = vrot.slane %v695_v50, 1  ;;  %v419_v60 = vadd.f32 %v418_v55, %v417_v41 }
 0x256   :  { %v426_v61 = vadd.f32 %v425_v57, %v424_v48  ;;  %v690_v3 = vadd.f32 %v689_v58, %v688_v29 }
 0x257   :  { %v697_v52 = vadd.f32 %v696_v59, %v695_v50  ;;  %v420_v62 = vrot.slane %v419_v60, 1  ;;  %v604_v63 = vpop.f32.mrf.mxu1 }
 0x258   :  { %v427_v0 = vrot.slane %v426_v61, 1  ;;  %v664_v45 = vmul.f32 %v604_v63, %v1173_v46  ;;  %v645_v2 = vpop.f32.mrf.mxu0 }
 0x259   :  { %v735_v4 = vrot.slane %v697_v52, 4  ;;  %v665_v54 = vmul.f32 %v645_v2, %v1175_v53  ;;  %v421_v12 = vadd.f32 %v420_v62, %v419_v60 }
 0x25a   :  { %v428_v7 = vadd.f32 %v427_v0, %v426_v61  ;;  %v698_v9 = vadd.f32 %v664_v45, %v662_v47  ;;  %v335_v10 = vpop.f32.mrf.mxu2 }
 0x25b   :  { %v739_v11 = vsel %vm469_vm4, %v690_v3, %v735_v4  ;;  %v705_v13 = vadd.f32 %v665_v54, %v663_v44  ;;  %v395_v14 = vmul.f32 %v335_v10, %v1179_v5  ;;  %v376_v15 = vpop.f32.mrf.mxu3 }
 0x25c   :  { %v742_v16 = vrot.slane %v739_v11, 7  ;;  %v466_v17 = vrot.slane %v428_v7, 4  ;;  %v699_v19 = vrot.slane %v698_v9, 4  ;;  %v396_v20 = vmul.f32 %v376_v15, %v1185_v6 }
 0x25d   :  { %v706_v21 = vrot.slane %v705_v13, 4  ;;  %v429_v22 = vadd.f32 %v395_v14, %v393_v43 }
 0x25e   :  { %v743_v23 = vsel %vm475_vm7, %v742_v16, %v1261_v18  ;;  %v471_v24 = vsel %vm469_vm4, %v421_v12, %v466_v17  ;;  %v700_v25 = vadd.f32 %v699_v19, %v698_v9  ;;  %v436_v26 = vadd.f32 %v396_v20, %v394_v8 }
 0x25f   :  { %v744_v27 = vsel %vm477_vm8, %v742_v16, %v743_v23  ;;  %v474_v28 = vrot.slane %v471_v24, 7  ;;  %v707_v31 = vadd.f32 %v706_v21, %v705_v13  ;;  %v430_v32 = vrot.slane %v429_v22, 4  ;;  %v607_v33 = vpop.f32.mrf.mxu1 }
 0x260   :  { %v701_v35 = vrot.slane %v700_v25, 2  ;;  %v437_v36 = vrot.slane %v436_v26, 4 }
 0x261   :  { %v476_v37 = vsel %vm475_vm7, %v474_v28, %v1267_v30  ;;  %v708_v38 = vrot.slane %v707_v31, 2  ;;  %v431_v39 = vadd.f32 %v430_v32, %v429_v22  ;;  %v666_v30 = vmul.f32 %v607_v33, %v1125_v42 }
 0x262   :  { %v478_v40 = vsel %vm477_vm8, %v474_v28, %v476_v37  ;;  %v702_v18 = vadd.f32 %v701_v35, %v700_v25  ;;  %v438_v41 = vadd.f32 %v437_v36, %v436_v26  ;;  %v338_v29 = vpop.f32.mrf.mxu2 }
 0x263   :  { %v709_v48 = vadd.f32 %v708_v38, %v707_v31  ;;  %v432_v49 = vrot.slane %v431_v39, 2  ;;  %v379_v50 = vpop.f32.mrf.mxu3  ;;  %v397_v44 = vmul.f32 %v338_v29, %v1157_v1 }
 0x264   :  { %v439_v55 = vrot.slane %v438_v41, 2  ;;  %v703_v56 = vrot.slane %v702_v18, 1  ;;  %v398_v54 = vmul.f32 %v379_v50, %v1163_v34  ;;  %v648_v34 = vpop.f32.mrf.mxu0 }
 0x265   :  { %v710_v57 = vrot.slane %v709_v48, 1  ;;  %v433_v58 = vadd.f32 %v432_v49, %v431_v39  ;;  %v667_v22 = vmul.f32 %v648_v34, %v1155_v51 }
 0x266   :  { %v440_v59 = vadd.f32 %v439_v55, %v438_v41  ;;  %v704_v0 = vadd.f32 %v703_v56, %v702_v18 }
 0x267   :  { %v711_v60 = vadd.f32 %v710_v57, %v709_v48  ;;  %v610_v61 = vpop.f32.mrf.mxu1  ;;  %v434_v52 = vrot.slane %v433_v58, 1 }
 0x268   :  { %v441_v62 = vrot.slane %v440_v59, 1  ;;  %v668_v63 = vmul.f32 %v610_v61, %v1173_v46 }
 0x269   :  { %v736_v47 = vrot.slane %v711_v60, 4  ;;  %v435_v42 = vadd.f32 %v434_v52, %v433_v58 }
 0x26a   :  { %v442_v45 = vadd.f32 %v441_v62, %v440_v59  ;;  %v712_v2 = vadd.f32 %v668_v63, %v666_v30  ;;  %v341_v3 = vpop.f32.mrf.mxu2 }
 0x26b   :  { %v740_v4 = vsel %vm469_vm4, %v704_v0, %v736_v47  ;;  %v399_v7 = vmul.f32 %v341_v3, %v1179_v5  ;;  %v382_v43 = vpop.f32.mrf.mxu3 }
 0x26c   :  { %v745_v8 = vrot.slane %v740_v4, 6  ;;  %v467_v9 = vrot.slane %v442_v45, 4  ;;  %v400_v46 = vmul.f32 %v382_v43, %v1185_v6  ;;  %v713_v15 = vrot.slane %v712_v2, 4 }
 0x26d   :  { %v443_v10 = vadd.f32 %v399_v7, %v397_v44 }
 0x26e   :  { %v746_v11 = vsel %vm480_vm9, %v745_v8, %v744_v27  ;;  %v472_v12 = vsel %vm469_vm4, %v435_v42, %v467_v9  ;;  %v450_v13 = vadd.f32 %v400_v46, %v398_v54  ;;  %v714_v23 = vadd.f32 %v713_v15, %v712_v2 }
 0x26f   :  { %v479_v14 = vrot.slane %v472_v12, 6  ;;  %v444_v16 = vrot.slane %v443_v10, 4  ;;  %v747_v1 = vsel %vm482_vm10, %v745_v8, %v746_v11 }
 0x270   :  { %v451_v17 = vrot.slane %v450_v13, 4  ;;  %v715_v32 = vrot.slane %v714_v23, 2 }
 0x271   :  { %v481_v5 = vsel %vm480_vm9, %v479_v14, %v478_v40  ;;  %v445_v19 = vadd.f32 %v444_v16, %v443_v10 }
 0x272   :  { %v452_v20 = vadd.f32 %v451_v17, %v450_v13  ;;  %v651_v21 = vpop.f32.mrf.mxu2  ;;  %v483_v6 = vsel %vm482_vm10, %v479_v14, %v481_v5  ;;  %v716_v39 = vadd.f32 %v715_v32, %v714_v23 }
 0x273   :  { %v446_v24 = vrot.slane %v445_v19, 2  ;;  %v669_v25 = vmul.f32 %v651_v21, %v1175_v53 }
 0x274   :  { %v453_v26 = vrot.slane %v452_v20, 2  ;;  %v717_v48 = vrot.slane %v716_v39, 1 }
 0x275   :  { %v447_v27 = vadd.f32 %v446_v24, %v445_v19  ;;  %v719_v28 = vadd.f32 %v669_v25, %v667_v22 }
 0x276   :  { %v454_v31 = vadd.f32 %v453_v26, %v452_v20  ;;  %v718_v57 = vadd.f32 %v717_v48, %v716_v39 }
 0x277   :  { %v720_v33 = vrot.slane %v719_v28, 4  ;;  %v448_v35 = vrot.slane %v447_v27, 1 }
 0x278   :  { %v455_v36 = vrot.slane %v454_v31, 1 }
 0x279   :  { %v721_v37 = vadd.f32 %v720_v33, %v719_v28  ;;  %v449_v18 = vadd.f32 %v448_v35, %v447_v27 }
 0x27a   :  { %v456_v38 = vadd.f32 %v455_v36, %v454_v31 }
 0x27b   :  { %v722_v40 = vrot.slane %v721_v37, 2 }
 0x27c   :  { %v468_v41 = vrot.slane %v456_v38, 4 }
 0x27d   :  { %v723_v29 = vadd.f32 %v722_v40, %v721_v37 }
 0x27e   :  { %v473_v51 = vsel %vm469_vm4, %v449_v18, %v468_v41 }
 0x27f   :  { %v484_v53 = vrot.slane %v473_v51, 5  ;;  %v724_v49 = vrot.slane %v723_v29, 1 }
 0x281   :  { %v725_v50 = vadd.f32 %v724_v49, %v723_v29  ;;  %v486_v55 = vsel %vm485_vm11, %v484_v53, %v483_v6 }
 0x282   :  { %v488_v56 = vsel %vm487_vm12, %v484_v53, %v486_v55 }
 0x283   :  { %v737_v58 = vrot.slane %v725_v50, 4  ;;  %490 = vst [vmem:[#allocation4] sm:$0xff] %v488_v56 }
 0x285   :  { %v741_v59 = vsel %vm469_vm4, %v718_v57, %v737_v58 }
 0x286   :  { %v748_v60 = vrot.slane %v741_v59, 5 }
 0x288   :  { %v749_v61 = vsel %vm485_vm11, %v748_v60, %v747_v1 }
 0x289   :  { %v750_v52 = vsel %vm487_vm12, %v748_v60, %v749_v61 }
 0x28a   :  { %753 = vst [vmem:[#allocation4 + $0x8] sm:$0xff] %v750_v52 }
 0x28b   :  { %779 = dma.vmem_to_hbm [thread:$0]  %s772_s6, 256, %s774_s0, [#allocation5], %s937_s18, %s937_s18, %s938_s19  }
 0x28c   :  { %922 = dma.done.wait [#allocation3], 32  }
 0x28d   :  { %923 = vsyncadd [#allocation3], 4294967264 }
 0x28e   :  { %924 = dma.done.wait [#allocation5], 256  }
 0x28f   :  { %925 = vsyncadd [#allocation5], 4294967040 }
 0x290   :  { %788 = vsyncpa [#allocation3], 1 }
 0x291   :  { %789 = vsyncpa [#allocation5], 1 }

</bundles_post_ra>
